<compile_context>
chip_gen: v5e
topology: v5e:2x2
jax: 0.10.0
libtpu: 0.0.40
codegen_flags: <defaults>
</compile_context>

<pallas_src>
import math
import functools

import jax
import jax.numpy as jnp
from jax.experimental import pallas as pl
from jax.experimental.pallas import tpu as pltpu

LANE = 128
SUBLANE = 8
MAX_BATCH_TILE = 1024   # rows per grid step (sweep 1024-2048 on v6e/v7x)


def _round_up(x, m):
    return ((x + m - 1) // m) * m


def actor_kernel(x_ref, w1_ref, b1_ref, w2_ref, b2_ref, w3_ref, b3_ref, out_ref):
    """Fused 3-layer MLP on one batch tile. Weights stay resident in VMEM."""
    # fc1 + ReLU   (bf16 MXU operands, f32 accumulation, f32 epilogue)
    x = x_ref[...].astype(jnp.bfloat16)
    h1 = jnp.dot(x, w1_ref[...], preferred_element_type=jnp.float32)
    h1 = jnp.maximum(h1 + b1_ref[...], 0.0)

    # fc2 + ReLU
    h2 = jnp.dot(h1.astype(jnp.bfloat16), w2_ref[...],
                 preferred_element_type=jnp.float32)
    h2 = jnp.maximum(h2 + b2_ref[...], 0.0)

    # fc3 + tanh   (output tile is lane-dense: padded action dim = 128, bf16)
    h3 = jnp.dot(h2.astype(jnp.bfloat16), w3_ref[...],
                 preferred_element_type=jnp.float32)
    out_ref[...] = jnp.tanh(h3 + b3_ref[...]).astype(out_ref.dtype)


def init_actor_params(key, state_size, action_size, fc1_units=256, fc2_units=128):
    """Deterministic f32 init mirroring the PyTorch module's __init__ semantics.

    Weights stored as (in, out) (transpose of torch's (out, in)).
    Weight limits follow the module: 1/sqrt(in*out) for fc1/fc2, 0.003 for fc3.
    Biases use torch's default Linear init: U(-1/sqrt(fan_in), 1/sqrt(fan_in)).
    """
    k1, k2, k3, kb1, kb2, kb3 = jax.random.split(key, 6)

    lim1 = 1.0 / math.sqrt(state_size * fc1_units)
    lim2 = 1.0 / math.sqrt(fc1_units * fc2_units)
    lim3 = 0.003

    w1 = jax.random.uniform(k1, (state_size, fc1_units), jnp.float32, -lim1, lim1)
    w2 = jax.random.uniform(k2, (fc1_units, fc2_units), jnp.float32, -lim2, lim2)
    w3 = jax.random.uniform(k3, (fc2_units, action_size), jnp.float32, -lim3, lim3)

    bl1 = 1.0 / math.sqrt(state_size)
    bl2 = 1.0 / math.sqrt(fc1_units)
    bl3 = 1.0 / math.sqrt(fc2_units)
    b1 = jax.random.uniform(kb1, (1, fc1_units), jnp.float32, -bl1, bl1)
    b2 = jax.random.uniform(kb2, (1, fc2_units), jnp.float32, -bl2, bl2)
    b3 = jax.random.uniform(kb3, (1, action_size), jnp.float32, -bl3, bl3)

    return (w1, b1, w2, b2, w3, b3)


def prepare_actor_params(params, state_size, action_size):
    """One-time: pad the action dim to a 128-lane slab, cast weights to bf16."""
    del state_size  # fc1's K dim is left unpadded; 16 still fits one MXU pass.
    w1, b1, w2, b2, w3, b3 = params
    out_pad = _round_up(action_size, LANE)

    w3p = jnp.zeros((w3.shape[0], out_pad), jnp.float32).at[:, :action_size].set(w3)
    b3p = jnp.zeros((1, out_pad), jnp.float32).at[:, :action_size].set(b3)

    return (w1.astype(jnp.bfloat16), b1,
            w2.astype(jnp.bfloat16), b2,
            w3p.astype(jnp.bfloat16), b3p)


@functools.partial(jax.jit, static_argnames=("action_size",))
def actor_forward(state, prepared_params, *, action_size):
    """state: (B, state_size) f32 -> actions (B, action_size) f32."""
    w1, b1, w2, b2, w3, b3 = prepared_params
    batch, state_size = state.shape
    out_pad = w3.shape[1]

    # Batch tiling: sublane-aligned, capped at MAX_BATCH_TILE rows per tile,
    # and additionally capped at ~ceil(B/2) so the grid has >= 2 steps when
    # possible (lets both v7x TensorCores participate).
    b8 = _round_up(batch, SUBLANE)
    tb = min(MAX_BATCH_TILE, max(SUBLANE, _round_up(pl.cdiv(b8, 2), SUBLANE)))
    grid = (pl.cdiv(batch, tb),)

    def const(shape):
        return pl.BlockSpec(shape, lambda i: (0, 0))

    out = pl.pallas_call(
        actor_kernel,
        out_shape=jax.ShapeDtypeStruct((batch, out_pad), jnp.bfloat16),
        grid=grid,
        in_specs=[
            pl.BlockSpec((tb, state_size), lambda i: (i, 0)),  # x: streamed per tile
            const(w1.shape), const(b1.shape),                  # weights/biases: resident
            const(w2.shape), const(b2.shape),
            const(w3.shape), const(b3.shape),
        ],
        out_specs=pl.BlockSpec((tb, out_pad), lambda i: (i, 0)),
        compiler_params=pltpu.CompilerParams(
            dimension_semantics=("parallel",)),
    )(state, w1, b1, w2, b2, w3, b3)

    return out[:, :action_size].astype(jnp.float32)


def _ref_forward_bf16(state, params):
    """Reference with the same mixed precision as the kernel (bf16 in, f32 acc)."""
    w1, b1, w2, b2, w3, b3 = params
    h1 = jnp.dot(state.astype(jnp.bfloat16), w1.astype(jnp.bfloat16),
                 preferred_element_type=jnp.float32) + b1
    h1 = jnp.maximum(h1, 0.0)
    h2 = jnp.dot(h1.astype(jnp.bfloat16), w2.astype(jnp.bfloat16),
                 preferred_element_type=jnp.float32) + b2
    h2 = jnp.maximum(h2, 0.0)
    h3 = jnp.dot(h2.astype(jnp.bfloat16), w3.astype(jnp.bfloat16),
                 preferred_element_type=jnp.float32) + b3
    return jnp.tanh(h3)


def _ref_forward_f32(state, params):
    w1, b1, w2, b2, w3, b3 = params
    h1 = jnp.maximum(state @ w1 + b1, 0.0)
    h2 = jnp.maximum(h1 @ w2 + b2, 0.0)
    return jnp.tanh(h2 @ w3 + b3)


if __name__ == "__main__":
    key = jax.random.PRNGKey(0)
    k_param, k_state, k_big = jax.random.split(key, 3)

    state_size = 16
    action_size = 4

    params = init_actor_params(k_param, state_size, action_size)
    prepared = prepare_actor_params(params, state_size, action_size)

    # --- small single-inference case (batch=2) ---
    state = jax.random.normal(k_state, (2, state_size), jnp.float32)
    actions = actor_forward(state, prepared, action_size=action_size)
    actions = jax.block_until_ready(actions)
    assert actions.shape == (2, action_size)

    ref_mixed = _ref_forward_bf16(state, params)
    ref_f32 = _ref_forward_f32(state, params)
    # Kernel stores a bf16 output slab (tanh in [-1,1] => abs rounding ~4e-3).
    assert jnp.allclose(actions, ref_mixed, atol=1e-2), "mismatch vs bf16 reference"
    assert jnp.allclose(actions, ref_f32, atol=5e-2), "mismatch vs f32 reference"

    # --- batched case exercising the multi-tile grid (ragged batch) ---
    big_batch = 1037
    big_state = jax.random.normal(k_big, (big_batch, state_size), jnp.float32)
    big_actions = actor_forward(big_state, prepared, action_size=action_size)
    big_actions = jax.block_until_ready(big_actions)
    assert big_actions.shape == (big_batch, action_size)

    big_ref_mixed = _ref_forward_bf16(big_state, params)
    big_ref_f32 = _ref_forward_f32(big_state, params)
    assert jnp.allclose(big_actions, big_ref_mixed, atol=1e-2), "big mismatch vs bf16 ref"
    assert jnp.allclose(big_actions, big_ref_f32, atol=5e-2), "big mismatch vs f32 ref"

    print("KERNEL_OK")
</pallas_src>

<mosaic_0001>
module attributes {stable_mosaic.version = 11 : i64} {
  func.func @actor_kernel(%arg0: i32, %arg1: memref<8x16xf32, #tpu.memory_space<vmem>>, %arg2: memref<16x256xbf16, #tpu.memory_space<vmem>>, %arg3: memref<1x256xf32, #tpu.memory_space<vmem>>, %arg4: memref<256x128xbf16, #tpu.memory_space<vmem>>, %arg5: memref<1x128xf32, #tpu.memory_space<vmem>>, %arg6: memref<128x128xbf16, #tpu.memory_space<vmem>>, %arg7: memref<1x128xf32, #tpu.memory_space<vmem>>, %arg8: memref<8x128xbf16, #tpu.memory_space<vmem>>) attributes {dimension_semantics = [#tpu.dimension_semantics<parallel>], iteration_bounds = array<i64: 1>, scalar_prefetch = 0 : i64, scratch_operands = 0 : i64, tpu.core_type = #tpu.core_type<tc>, window_params = [{transform_indices = @transform_0, window_bounds = array<i64: 8, 16>}, {pipeline_mode = #tpu.pipeline_mode<synchronous>, transform_indices = @transform_1, window_bounds = array<i64: 16, 256>}, {pipeline_mode = #tpu.pipeline_mode<synchronous>, transform_indices = @transform_2, window_bounds = array<i64: 1, 256>}, {pipeline_mode = #tpu.pipeline_mode<synchronous>, transform_indices = @transform_3, window_bounds = array<i64: 256, 128>}, {pipeline_mode = #tpu.pipeline_mode<synchronous>, transform_indices = @transform_4, window_bounds = array<i64: 1, 128>}, {pipeline_mode = #tpu.pipeline_mode<synchronous>, transform_indices = @transform_5, window_bounds = array<i64: 128, 128>}, {pipeline_mode = #tpu.pipeline_mode<synchronous>, transform_indices = @transform_6, window_bounds = array<i64: 1, 128>}, {transform_indices = @transform_7, window_bounds = array<i64: 8, 128>}]} {
    %c0 = arith.constant 0 : index
    %c0_0 = arith.constant 0 : index
    %0 = vector.load %arg1[%c0, %c0_0] : memref<8x16xf32, #tpu.memory_space<vmem>>, vector<8x16xf32>
    %1 = arith.truncf %0 : vector<8x16xf32> to vector<8x16xbf16>
    %c0_1 = arith.constant 0 : index
    %c0_2 = arith.constant 0 : index
    %2 = vector.load %arg2[%c0_1, %c0_2] : memref<16x256xbf16, #tpu.memory_space<vmem>>, vector<16x256xbf16>
    %cst = arith.constant dense<0.000000e+00> : vector<8x256xf32>
    %3 = tpu.matmul %1, %2, %cst {dimension_numbers = #tpu.dot_dimension_numbers<[1], [0], [0], [1], [0, 0, 1, 1], [], []>} : vector<8x16xbf16>, vector<16x256xbf16>, vector<8x256xf32> -> vector<8x256xf32>
    %c0_3 = arith.constant 0 : index
    %c0_4 = arith.constant 0 : index
    %4 = vector.load %arg3[%c0_3, %c0_4] : memref<1x256xf32, #tpu.memory_space<vmem>>, vector<1x256xf32>
    %5 = vector.broadcast %4 : vector<1x256xf32> to vector<8x256xf32>
    %6 = arith.addf %3, %5 : vector<8x256xf32>
    %cst_5 = arith.constant 0.000000e+00 : f32
    %7 = vector.broadcast %cst_5 : f32 to vector<8x256xf32>
    %8 = arith.maximumf %6, %7 : vector<8x256xf32>
    %9 = arith.truncf %8 : vector<8x256xf32> to vector<8x256xbf16>
    %c0_6 = arith.constant 0 : index
    %c0_7 = arith.constant 0 : index
    %10 = vector.load %arg4[%c0_6, %c0_7] : memref<256x128xbf16, #tpu.memory_space<vmem>>, vector<256x128xbf16>
    %cst_8 = arith.constant dense<0.000000e+00> : vector<8x128xf32>
    %11 = tpu.matmul %9, %10, %cst_8 {dimension_numbers = #tpu.dot_dimension_numbers<[1], [0], [0], [1], [0, 0, 1, 1], [], []>} : vector<8x256xbf16>, vector<256x128xbf16>, vector<8x128xf32> -> vector<8x128xf32>
    %c0_9 = arith.constant 0 : index
    %c0_10 = arith.constant 0 : index
    %12 = vector.load %arg5[%c0_9, %c0_10] : memref<1x128xf32, #tpu.memory_space<vmem>>, vector<1x128xf32>
    %13 = vector.broadcast %12 : vector<1x128xf32> to vector<8x128xf32>
    %14 = arith.addf %11, %13 : vector<8x128xf32>
    %cst_11 = arith.constant 0.000000e+00 : f32
    %15 = vector.broadcast %cst_11 : f32 to vector<8x128xf32>
    %16 = arith.maximumf %14, %15 : vector<8x128xf32>
    %17 = arith.truncf %16 : vector<8x128xf32> to vector<8x128xbf16>
    %c0_12 = arith.constant 0 : index
    %c0_13 = arith.constant 0 : index
    %18 = vector.load %arg6[%c0_12, %c0_13] : memref<128x128xbf16, #tpu.memory_space<vmem>>, vector<128x128xbf16>
    %cst_14 = arith.constant dense<0.000000e+00> : vector<8x128xf32>
    %19 = tpu.matmul %17, %18, %cst_14 {dimension_numbers = #tpu.dot_dimension_numbers<[1], [0], [0], [1], [0, 0, 1, 1], [], []>} : vector<8x128xbf16>, vector<128x128xbf16>, vector<8x128xf32> -> vector<8x128xf32>
    %c0_15 = arith.constant 0 : index
    %c0_16 = arith.constant 0 : index
    %20 = vector.load %arg7[%c0_15, %c0_16] : memref<1x128xf32, #tpu.memory_space<vmem>>, vector<1x128xf32>
    %21 = vector.broadcast %20 : vector<1x128xf32> to vector<8x128xf32>
    %22 = arith.addf %19, %21 : vector<8x128xf32>
    %23 = math.tanh %22 : vector<8x128xf32>
    %24 = arith.truncf %23 : vector<8x128xf32> to vector<8x128xbf16>
    %c0_17 = arith.constant 0 : index
    %c0_18 = arith.constant 0 : index
    %25 = vector.load %arg8[%c0_17, %c0_18] : memref<8x128xbf16, #tpu.memory_space<vmem>>, vector<8x128xbf16>
    tpu.vector_store %arg8[%c0_17, %c0_18], %24 {strides = array<i32>} : memref<8x128xbf16, #tpu.memory_space<vmem>>, vector<8x128xbf16>,
    return
  }
  func.func @transform_0(%arg0: i32) -> (i32, i32) {
    %c0_i32 = arith.constant 0 : i32
    %c0_i32_0 = arith.constant 0 : i32
    return %arg0, %c0_i32 : i32, i32
  }
  func.func @transform_1(%arg0: i32) -> (i32, i32) {
    %c0_i32 = arith.constant 0 : i32
    %c0_i32_0 = arith.constant 0 : i32
    %c0_i32_1 = arith.constant 0 : i32
    return %c0_i32, %c0_i32_0 : i32, i32
  }
  func.func @transform_2(%arg0: i32) -> (i32, i32) {
    %c0_i32 = arith.constant 0 : i32
    %c0_i32_0 = arith.constant 0 : i32
    %c0_i32_1 = arith.constant 0 : i32
    return %c0_i32, %c0_i32_0 : i32, i32
  }
  func.func @transform_3(%arg0: i32) -> (i32, i32) {
    %c0_i32 = arith.constant 0 : i32
    %c0_i32_0 = arith.constant 0 : i32
    %c0_i32_1 = arith.constant 0 : i32
    return %c0_i32, %c0_i32_0 : i32, i32
  }
  func.func @transform_4(%arg0: i32) -> (i32, i32) {
    %c0_i32 = arith.constant 0 : i32
    %c0_i32_0 = arith.constant 0 : i32
    %c0_i32_1 = arith.constant 0 : i32
    return %c0_i32, %c0_i32_0 : i32, i32
  }
  func.func @transform_5(%arg0: i32) -> (i32, i32) {
    %c0_i32 = arith.constant 0 : i32
    %c0_i32_0 = arith.constant 0 : i32
    %c0_i32_1 = arith.constant 0 : i32
    return %c0_i32, %c0_i32_0 : i32, i32
  }
  func.func @transform_6(%arg0: i32) -> (i32, i32) {
    %c0_i32 = arith.constant 0 : i32
    %c0_i32_0 = arith.constant 0 : i32
    %c0_i32_1 = arith.constant 0 : i32
    return %c0_i32, %c0_i32_0 : i32, i32
  }
  func.func @transform_7(%arg0: i32) -> (i32, i32) {
    %c0_i32 = arith.constant 0 : i32
    %c0_i32_0 = arith.constant 0 : i32
    return %arg0, %c0_i32 : i32, i32
  }
}

</mosaic_0001>

<bundles_post_ra>
// kernel: actor_forward.1
= control target key start
LH: loop header
LB: loop body
LE: loop exit
PB: predicated region body
PF: predicated region fallthrough
CT: control target
= control target key end

     0   :  { %12 = vsyncpa [#allocation3], 0  ;;  %s820_s0 = inlined_call_operand.hbm [shape: f32[2,16], index: 0, kind: input, shape index: {}]   ;;  %s821_s1 = inlined_call_operand.hbm [shape: bf16[16,256], index: 1, kind: input, shape index: {}]   ;;  %s822_s2 = inlined_call_operand.hbm [shape: f32[1,256], index: 2, kind: input, shape index: {}]   ;;  %s823_s3 = inlined_call_operand.hbm [shape: bf16[256,128], index: 3, kind: input, shape index: {}]   ;;  %s824_s4 = inlined_call_operand.vmem [shape: f32[1,128], index: 4, kind: input, shape index: {}]   ;;  %s825_s5 = inlined_call_operand.hbm [shape: bf16[128,128], index: 5, kind: input, shape index: {}]   ;;  %s826_s6 = inlined_call_operand.vmem [shape: f32[1,128], index: 6, kind: input, shape index: {}]   ;;  %s827_s7 = inlined_call_operand.vmem [shape: bf16[2,128], index: 7, kind: output, shape index: {}]  }
   0x1   :  { %13 = vsyncpa [#allocation5], 0 }
   0x2   :  { %14 = vsyncpa [#allocation8], 0  ;;  %s32_s26 = sshll.u32 %s821_s1, 4  ;;  %s33_s26 = int_to_ptr.hbm [resolvable:$true] %s32_s26 }
   0x3   :  { %18 = vsyncadd [#allocation3], 96  ;;  %s743_s27 = smov [#allocation4]   ;;  %s56_s8 = sshll.u32 %s823_s3, 4  ;;  %s57_s8 = int_to_ptr.hbm [resolvable:$true] %s56_s8 }
   0x4   :  { %s34_s28 = sshll.u32 %s743_s27, 4  ;;  %s744_s9 = smov 128   ;;  %s35_s28 = int_to_ptr.vmem [resolvable:$true] %s34_s28 }
   0x5   :  { %s745_s10 = smov 8   ;;  %s746_s11 = smov [#allocation7]  }
   0x6   :  { %40 = dma.hbm_to_vmem [thread:$0]  %s33_s26, 256, %s35_s28, [#allocation5], %s744_s9, %s744_s9, %s745_s10  }
   0x7   :  { %s58_s12 = sshll.u32 %s746_s11, 4  ;;  %s747_s13 = smov 64   ;;  %s59_s12 = int_to_ptr.vmem [resolvable:$true] %s58_s12 }
   0x8   :  { %s748_s14 = smov 4   ;;  %s19_s16 = sshll.u32 %s820_s0, 4  ;;  %s20_s16 = int_to_ptr.hbm [resolvable:$true] %s19_s16 }
   0x9   :  { %64 = dma.hbm_to_vmem [thread:$0]  %s57_s8, 2048, %s59_s12, [#allocation8], %s747_s13, %s747_s13, %s748_s14  }
   0xa   :  { %s749_s17 = smov [#allocation2]   ;;  %s46_s20 = sshll.u32 %s822_s2, 4  ;;  %s47_s20 = int_to_ptr.hbm [resolvable:$true] %s46_s20 }
   0xb   :  { %s21_s18 = sshll.u32 %s749_s17, 4  ;;  %s750_s21 = smov 32   ;;  %s22_s18 = int_to_ptr.vmem [resolvable:$true] %s21_s18 }
   0xc   :  { %s751_s22 = smov 2   ;;  %s752_s23 = smov [#allocation6]  }
   0xd   :  { %27 = dma.hbm_to_vmem [thread:$0]  %s20_s16, 32, %s22_s18, [#allocation3], %s750_s21, %s750_s21, %s751_s22  }
   0xe   :  { %s48_s24 = sshll.u32 %s752_s23, 4  ;;  %s71_s27 = sshll.u32 %s825_s5, 4  ;;  %s49_s24 = int_to_ptr.vmem [resolvable:$true] %s48_s24  ;;  %s72_s27 = int_to_ptr.hbm [resolvable:$true] %s71_s27 }
   0xf   :  { %51 = dma.hbm_to_vmem [thread:$0]  %s47_s20, 32, %s49_s24, [#allocation5]  }
  0x10   :  { %s753_s0 = smov [#allocation9]  }
  0x11   :  { %s73_s28 = sshll.u32 %s753_s0, 4  ;;  %s74_s28 = int_to_ptr.vmem [resolvable:$true] %s73_s28 }
  0x12   :  { %79 = dma.hbm_to_vmem [thread:$0]  %s72_s27, 1024, %s74_s28, [#allocation8], %s747_s13, %s747_s13, %s748_s14  }
  0x13   :  { %737 = dma.done.wait [#allocation3], 128  }
  0x14   :  { %738 = vsyncadd [#allocation3], 4294967168 }
  0x15   :  { %739 = dma.done.wait [#allocation5], 288  }
  0x16   :  { %740 = vsyncadd [#allocation5], 4294967008 }
  0x17   :  { %741 = dma.done.wait [#allocation8], 3072  }
  0x18   :  { %742 = vsyncadd [#allocation8], 4294964224  ;;  %v472_v0 = vld [vmem:[#allocation4] sm:$0xf]  ;;  %v577_v1 = vld [vmem:[#allocation4 + $0x4] sm:$0xf0] }
  0x19   :  { %v103_v2 = vld [vmem:[#allocation2] sm:$0xff]  ;;  %v473_v3 = vor.u32 %v577_v1, %v472_v0  ;;  %v576_v4 = vld [vmem:[#allocation4 + $0x4] sm:$0xf]  ;;  %v474_v5 = vld [vmem:[#allocation4 + $0x8] sm:$0xf0]  ;;  %vm123_vm0 = vcmask 130048  }
  0x1a   :  { %v585_v6 = vld [vmem:[#allocation7 + $0x38] sm:$0xff]  ;;  %v104_v7 = vpack.c.bf16 %v103_v2, %v103_v2  ;;  %v477_v8 = vor.u32 %v576_v4, %v474_v5  ;;  %v584_v9 = vld [vmem:[#allocation7 + $0x30] sm:$0xff]  ;;  %v583_v12 = vld [vmem:[#allocation7 + $0x28] sm:$0xff]  ;;  %vm402_vm1 = vcmask 1040384  }
  0x1b   :  { %134 = vmatpush.bf16.msra.mxu1 %v473_v3  ;;  %289 = vmatpush.bf16.msra.mxu2 %v585_v6  ;;  %v593_v10 = vld [vmem:[#allocation7 + $0x78] sm:$0xff]  ;;  %v592_v11 = vld [vmem:[#allocation7 + $0x70] sm:$0xff]  ;;  %v582_v13 = vld [vmem:[#allocation7 + $0x20] sm:$0xff] }
  0x1c   :  { %302 = vmatpush.bf16.msra.mxu3 %v593_v10  ;;  %v581_v14 = vld [vmem:[#allocation7 + $0x18] sm:$0xff]  ;;  %v580_v15 = vld [vmem:[#allocation7 + $0x10] sm:$0xff]  ;;  %v579_v16 = vld [vmem:[#allocation7 + $0x8] sm:$0xff] }
  0x1d   :  { %v591_v17 = vld [vmem:[#allocation7 + $0x68] sm:$0xff]  ;;  %v578_v18 = vld [vmem:[#allocation7] sm:$0xff]  ;;  %v589_v20 = vld [vmem:[#allocation7 + $0x58] sm:$0xff] }
  0x1e   :  { %478 = vmatmul.msk.bf16.vlgmr.msra.gmra.mxu1 %vm123_vm0, %v104_v7  ;;  %v590_v19 = vld [vmem:[#allocation7 + $0x60] sm:$0xff]  ;;  %v588_v21 = vld [vmem:[#allocation7 + $0x50] sm:$0xff]  ;;  %v587_v22 = vld [vmem:[#allocation7 + $0x48] sm:$0xff] }
  0x1f   :  { %147 = vmatpush.bf16.msrb.mxu1 %v477_v8  ;;  %290 = vmatpush.bf16.msra.mxu2 %v584_v9  ;;  %v586_v23 = vld [vmem:[#allocation7 + $0x40] sm:$0xff]  ;;  %v601_v24 = vld [vmem:[#allocation9 + $0x38] sm:$0xff]  ;;  %v600_v26 = vld [vmem:[#allocation9 + $0x30] sm:$0xff] }
  0x20   :  { %303 = vmatpush.bf16.msra.mxu3 %v592_v11  ;;  %v107_v25 = vld [vmem:[#allocation6] sm:$0x3]  ;;  %385 = vmatpush.bf16.msra.mxu0 %v601_v24  ;;  %v599_v39 = vld [vmem:[#allocation9 + $0x28] sm:$0xff]  ;;  %v598_v40 = vld [vmem:[#allocation9 + $0x20] sm:$0xff] }
  0x21   :  { %v109_v27 = vperm.slane %v107_v25, 0  ;;  %v110_v33 = vperm.slane %v107_v25, 1  ;;  %v597_v41 = vld [vmem:[#allocation9 + $0x18] sm:$0xff]  ;;  %v596_v42 = vld [vmem:[#allocation9 + $0x10] sm:$0xff]  ;;  %v595_v43 = vld [vmem:[#allocation9 + $0x8] sm:$0xff] }
  0x22   :  { %v594_v44 = vld [vmem:[#allocation9] sm:$0xff] }
  0x23   :  { %291 = vmatpush.bf16.msra.mxu2 %v583_v12  ;;  %v613_v47 = vld [vmem:[%s824_s4] ss:$0 sm:$0xff] }
  0x24   :  { %304 = vmatpush.bf16.msra.mxu3 %v591_v17  ;;  %386 = vmatpush.bf16.msra.mxu0 %v600_v26  ;;  %v614_v54 = vld [vmem:[%s826_s6] ss:$0 sm:$0xff] }
  0x27   :  { %292 = vmatpush.bf16.msra.mxu2 %v582_v13 }
  0x28   :  { %305 = vmatpush.bf16.msra.mxu3 %v590_v19  ;;  %387 = vmatpush.bf16.msra.mxu0 %v599_v39 }
  0x2b   :  { %293 = vmatpush.bf16.msra.mxu2 %v581_v14 }
  0x2c   :  { %306 = vmatpush.bf16.msra.mxu3 %v589_v20  ;;  %388 = vmatpush.bf16.msra.mxu0 %v598_v40 }
  0x2e   :  { %479 = vmatmul.msk.bf16.vlgmr.msrb.gmra.mxu1 %vm123_vm0, %v104_v7 }
  0x2f   :  { %294 = vmatpush.bf16.msra.mxu2 %v580_v15 }
  0x30   :  { %307 = vmatpush.bf16.msra.mxu3 %v588_v21  ;;  %389 = vmatpush.bf16.msra.mxu0 %v597_v41 }
  0x33   :  { %295 = vmatpush.bf16.msra.mxu2 %v579_v16 }
  0x34   :  { %308 = vmatpush.bf16.msra.mxu3 %v587_v22  ;;  %390 = vmatpush.bf16.msra.mxu0 %v596_v42 }
  0x37   :  { %296 = vmatpush.bf16.msra.mxu2 %v578_v18 }
  0x38   :  { %309 = vmatpush.bf16.msra.mxu3 %v586_v23  ;;  %391 = vmatpush.bf16.msra.mxu0 %v595_v43 }
  0x3c   :  { %392 = vmatpush.bf16.msra.mxu0 %v594_v44 }
  0x9b   :  { %v136_v28 = vpop.f32.mrf.mxu1 }
  0x9c   :  { %v137_v29 = vadd.f32 %v136_v28, %v109_v27 }
  0x9e   :  { %v153_v30 = vmax.f32 %v137_v29, 0.0 }
  0xa0   :  { %v155_v31 = vpack.c.bf16 %v153_v30, %v153_v30 }
  0xa2   :  { %297 = vmatmul.bf16.vlgmr.msra.gmra.mxu2 %v155_v31 }
  0xa3   :  { %v138_v32 = vpop.f32.mrf.mxu1 }
  0xab   :  { %v149_v34 = vpop.f32.mrf.mxu1 }
  0xac   :  { %v150_v35 = vadd.f32 %v149_v34, %v110_v33 }
  0xae   :  { %v154_v36 = vmax.f32 %v150_v35, 0.0 }
  0xb0   :  { %v156_v37 = vpack.c.bf16 %v154_v36, %v154_v36 }
  0xb2   :  { %310 = vmatmul.bf16.vlgmr.msra.gmra.mxu3 %v156_v37 }
  0xb3   :  { %v151_v38 = vpop.f32.mrf.mxu1 }
 0x125   :  { %v298_v45 = vpop.f32.mrf.mxu2 }
 0x126   :  { %v299_v48 = vadd.f32 %v613_v47, %v298_v45 }
 0x12d   :  { %v300_v46 = vpop.f32.mrf.mxu2 }
 0x135   :  { %v311_v49 = vpop.f32.mrf.mxu3 }
 0x136   :  { %v312_v50 = vadd.f32 %v311_v49, %v299_v48 }
 0x138   :  { %v315_v51 = vmax.f32 %v312_v50, 0.0 }
 0x13a   :  { %v316_v52 = vpack.c.bf16 %v315_v51, %v315_v51 }
 0x13c   :  { %393 = vmatmul.bf16.vlgmr.msra.gmra.mxu0 %v316_v52 }
 0x13d   :  { %v313_v53 = vpop.f32.mrf.mxu3 }
 0x1b9   :  { %v394_v55 = vpop.f32.mrf.mxu0 }
 0x1ba   :  { %v395_v56 = vadd.f32 %v614_v54, %v394_v55 }
 0x1bc   :  { %615 = vtanh.f32 %v395_v56 }
 0x1c1   :  { %v396_v57 = vpop.f32.mrf.mxu0 }
 0x1c2   :  { %v616_v58 = vpop.eup %615 }
 0x1c3   :  { %v399_v59 = vpack.c.bf16 %v616_v58, %v616_v58 }
 0x1c5   :  { %v401_v60 = vrot.slane %v399_v59, 3 }
 0x1c7   :  { %v405_v61 = vsel %vm402_vm1, %v399_v59, %v401_v60 }
 0x1c8   :  { %422 = vst [vmem:[#allocation10] sm:$0x1] %v405_v61 }
 0x1cf   :  { %v444_v62 = vld [vmem:[#allocation10] sm:$0x1] }
 0x1d0   :  { %445 = vst [vmem:[%s827_s7] sm:$0x1] %v444_v62 }
 0x1d1   :  { %463 = vsyncpa [#allocation3], 1 }
 0x1d2   :  { %464 = vsyncpa [#allocation5], 1 }
 0x1d3   :  { %465 = vsyncpa [#allocation8], 1 }

</bundles_post_ra>
